<compile_context>
chip_gen: v6e
topology: v6e:2x2x1
jax: 0.10.0
libtpu: 0.0.40
codegen_flags: <defaults>
</compile_context>

<pallas_src>
import functools
import math

import jax
import jax.numpy as jnp
from jax import lax
from jax.experimental import pallas as pl
from jax.experimental.pallas import tpu as pltpu


# --------------------------------------------------------------------------
# Kernels
# --------------------------------------------------------------------------
def _rmsnorm_kernel_flat(x_ref, w_ref, o_ref, *, eps, low_precision):
    """groups == 1: the lane axis is exactly the normalized axis."""
    x = x_ref[...]
    xf = x.astype(jnp.float32)
    ms = jnp.mean(xf * xf, axis=-1, keepdims=True)          # (tm, 1) f32
    inv = lax.rsqrt(ms + eps)                               # (tm, 1) EUP
    if low_precision:
        # bf16 VALU path (v6e/v7x): x never lives as a full f32 tile for the
        # output product; the f32 upcast above is fused into the reduce.
        o_ref[...] = (x * inv.astype(x.dtype) * w_ref[...]).astype(o_ref.dtype)
    else:
        o_ref[...] = (xf * inv * w_ref[...].astype(jnp.float32)).astype(o_ref.dtype)


def _rmsnorm_kernel_grouped(x_ref, w_ref, selr_ref, selb_ref, o_ref, *,
                            eps, inv_dim, low_precision):
    """groups > 1: `groups` logical rows packed along the 128-lane axis.

    selr_ref: (groups*dim, groups) constant 0/1 matrix -> segmented sum.
    selb_ref: (groups, groups*dim) constant 0/1 matrix -> broadcast back.
    Both are hoisted to the wrapper; no per-step iota/compare/cast filler.
    """
    x = x_ref[...]
    if low_precision:
        cd = x.dtype
        xin = x
        xx = x * x                       # bf16 VALU; MXU accumulates in f32
    else:
        cd = jnp.float32
        xin = x.astype(jnp.float32)
        xx = xin * xin
    ssq = jnp.dot(xx, selr_ref[...], preferred_element_type=jnp.float32)   # (tm, g)
    inv = lax.rsqrt(ssq * inv_dim + eps)                                   # (tm, g) f32
    scale = jnp.dot(inv.astype(cd), selb_ref[...], preferred_element_type=cd)  # (tm, g*dim)
    o_ref[...] = (xin * scale * w_ref[...]).astype(o_ref.dtype)


# --------------------------------------------------------------------------
# Tiling helpers
# --------------------------------------------------------------------------
def _sublane_multiple(itemsize):
    # Sub-32-bit dtypes pack along sublanes: (8,128) f32, (16,128) bf16, (32,128) int8.
    return {4: 8, 2: 16, 1: 32}.get(int(itemsize), 8)


def _tpu_vmem_capacity_and_generation():
    gen = None
    try:
        kind = jax.devices()[0].device_kind.lower()
        for g in (7, 6, 5, 4):
            if f"v{g}" in kind:
                gen = g
                break
    except Exception:
        pass
    cap = None
    try:
        cap = int(pltpu.get_tpu_info().vmem_capacity_bytes)
    except Exception:
        cap = None
    if cap is None or cap <= 0:
        cap = (64 << 20) if (gen is not None and gen >= 7) else (128 << 20)
    if gen is not None and gen >= 7:
        cap = min(cap, 64 << 20)        # v7x: 64 MiB per TensorCore
    return cap, gen


def _choose_row_tile(n_rows, lane_dim, itemsize, target_tile_bytes, min_blocks):
    """Biggest row tile that fits the per-buffer VMEM target, no tiny cliffs."""
    sub = _sublane_multiple(itemsize)
    row_bytes = max(1, lane_dim * itemsize)
    cap = max(sub, (target_tile_bytes // row_bytes) // sub * sub)
    if n_rows <= cap:
        # Split a fits-in-one-block problem only when worthwhile (pipelining /
        # second v7x core); never below the sublane packing.
        if min_blocks > 1 and n_rows >= min_blocks * sub:
            return max(sub, (n_rows // min_blocks) // sub * sub)
        return n_rows
    # Accept an aligned exact divisor only if it keeps >= cap/2 of the tile;
    # otherwise keep the cap-sized tile with a ragged (cdiv) grid.  Rows are
    # independent so the masked partial final block is benign.
    floor = max(sub, (cap // 2) // sub * sub)
    t = cap
    while t >= floor:
        if n_rows % t == 0:
            return t
        t -= sub
    return cap


# --------------------------------------------------------------------------
# Public entry point
# --------------------------------------------------------------------------
def rms_normalization(x, weight, eps=1e-5, *, target_tile_bytes=None):
    """RMSNorm over the last axis of x, matching the PyTorch module."""
    orig_shape = x.shape
    dim = int(orig_shape[-1])
    rows = int(math.prod(orig_shape[:-1]))
    itemsize = jnp.dtype(x.dtype).itemsize

    vmem_cap, gen = _tpu_vmem_capacity_and_generation()
    small_vmem = vmem_cap <= (64 << 20)            # v7x-class TensorCore
    # bf16 VALU exists on v6e/v7x (not v5e): do the normalize multiplies in
    # bf16 there; the x*x reduction always accumulates in f32.
    low_precision = bool(x.dtype == jnp.bfloat16 and gen is not None and gen >= 6)
    compute_dtype = x.dtype if low_precision else jnp.float32

    # Lane-density fold: make the packed last dim a multiple of 128 so every
    # store is a full, unmasked 128-lane vst.
    groups = 1
    if dim % 128 != 0:
        g = math.lcm(dim, 128) // dim
        if g * dim <= 4096:
            groups = g
    lane_dim = groups * dim

    x_flat = x.reshape(rows, dim)
    pad_rows = (-rows) % groups
    if pad_rows:
        # Rows are independent; padded rows are computed then sliced away.
        x_flat = jnp.pad(x_flat, ((0, pad_rows), (0, 0)))
    padded_rows = rows + pad_rows
    n_rows = padded_rows // groups
    x2d = x_flat.reshape(n_rows, lane_dim)

    w_row = jnp.tile(weight.reshape(1, dim), (1, groups)).astype(compute_dtype)

    # Generation/dtype-aware tile target: v7x has 64 MiB/TC and f32 upcast
    # temporaries roughly double bf16 footprints; v5e/v6e have 128 MiB.
    if target_tile_bytes is None:
        if itemsize >= 4:
            target_tile_bytes = (6 << 20) if small_vmem else (10 << 20)
        else:
            target_tile_bytes = (3 << 20) if small_vmem else (6 << 20)

    total_bytes = n_rows * lane_dim * itemsize
    if total_bytes >= (4 << 20):
        min_blocks = 4 if small_vmem else 2        # keep v7x's 2 cores / pipeline busy
    else:
        min_blocks = 1

    row_tile = _choose_row_tile(n_rows, lane_dim, itemsize, target_tile_bytes, min_blocks)
    grid = (pl.cdiv(n_rows, row_tile),)

    # VMEM budget: double-buffered in/out tiles + in-kernel f32 temporaries
    # (upcast / square / scale) + weight + selection matrices + headroom,
    # clamped below the physical per-core capacity.
    tile_in_bytes = row_tile * lane_dim * itemsize
    tile_f32_bytes = row_tile * lane_dim * 4
    aux_bytes = lane_dim * 4 * (1 + 2 * groups)
    vmem_limit = 4 * tile_in_bytes + 3 * tile_f32_bytes + 4 * aux_bytes + (2 << 20)
    vmem_limit = int(max(16 << 20, min(vmem_cap - (4 << 20), vmem_limit)))

    x_spec = pl.BlockSpec((row_tile, lane_dim), lambda i: (i, 0))
    w_spec = pl.BlockSpec((1, lane_dim), lambda i: (0, 0))
    out_spec = pl.BlockSpec((row_tile, lane_dim), lambda i: (i, 0))

    if groups == 1:
        kernel = functools.partial(_rmsnorm_kernel_flat, eps=float(eps),
                                   low_precision=low_precision)
        in_specs = [x_spec, w_spec]
        operands = (x2d, w_row)
    else:
        # Hoisted constant 0/1 selection matrices (segmented reduce + broadcast).
        seg = jnp.arange(lane_dim, dtype=jnp.int32) // dim
        gid = jnp.arange(groups, dtype=jnp.int32)
        sel_reduce = (seg[:, None] == gid[None, :]).astype(compute_dtype)  # (lane_dim, groups)
        sel_bcast = (gid[:, None] == seg[None, :]).astype(compute_dtype)   # (groups, lane_dim)
        kernel = functools.partial(_rmsnorm_kernel_grouped, eps=float(eps),
                                   inv_dim=1.0 / dim, low_precision=low_precision)
        in_specs = [x_spec, w_spec,
                    pl.BlockSpec((lane_dim, groups), lambda i: (0, 0)),
                    pl.BlockSpec((groups, lane_dim), lambda i: (0, 0))]
        operands = (x2d, w_row, sel_reduce, sel_bcast)

    cost = pl.CostEstimate(
        flops=int(4 * padded_rows * dim),
        transcendentals=int(padded_rows),
        bytes_accessed=int(2 * padded_rows * dim * itemsize + dim * 4),
    )

    out2d = pl.pallas_call(
        kernel,
        out_shape=jax.ShapeDtypeStruct((n_rows, lane_dim), x.dtype),
        grid_spec=pltpu.PrefetchScalarGridSpec(
            num_scalar_prefetch=0,
            grid=grid,
            in_specs=in_specs,
            out_specs=out_spec,
        ),
        compiler_params=pltpu.CompilerParams(
            dimension_semantics=("parallel",),
            vmem_limit_bytes=vmem_limit,
        ),
        cost_estimate=cost,
    )(*operands)

    out_flat = out2d.reshape(padded_rows, dim)
    if pad_rows:
        out_flat = out_flat[:rows]
    return out_flat.reshape(orig_shape)


def rms_normalization_ref(x, weight, eps=1e-5):
    """Pure-JAX reference mirroring the PyTorch forward exactly."""
    xf = x.astype(jnp.float32)
    rms = jnp.sqrt(eps + jnp.mean(xf * xf, axis=-1, keepdims=True))
    x_norm = xf / rms
    return (x_norm * weight.astype(jnp.float32)).astype(x.dtype)


if __name__ == "__main__":
    key = jax.random.PRNGKey(0)
    k1, k2, k3, k4, k5, kw = jax.random.split(key, 6)

    # A) Module-consistent small shape: (batch, seq, hidden) with hidden = dim.
    batch, seq, hidden = 2, 8, 32
    x = jax.random.normal(k1, (batch, seq, hidden), dtype=jnp.float32)
    weight = 1.0 + 0.1 * jax.random.normal(kw, (hidden,), dtype=jnp.float32)
    out = jax.block_until_ready(rms_normalization(x, weight, eps=1e-5))
    ref = rms_normalization_ref(x, weight, eps=1e-5)
    assert out.shape == x.shape and out.dtype == x.dtype
    assert jnp.allclose(out, ref, atol=1e-5, rtol=1e-5), "mismatch (folded dim=32)"

    # B) Lane-dense hidden size (groups == 1), f32.
    x2 = jax.random.normal(k2, (3, 5, 256), dtype=jnp.float32)
    w2 = jnp.ones((256,), dtype=jnp.float32)
    out2 = jax.block_until_ready(rms_normalization(x2, w2, eps=1e-5))
    assert jnp.allclose(out2, rms_normalization_ref(x2, w2, eps=1e-5),
                        atol=1e-5, rtol=1e-5), "mismatch (plain dim=256)"

    # C) bf16 input (bf16 multiplies on v6e/v7x, f32 path elsewhere).
    x3 = jax.random.normal(k3, (4, 8, 256)).astype(jnp.bfloat16)
    w3 = jnp.ones((256,), dtype=jnp.float32)
    out3 = jax.block_until_ready(rms_normalization(x3, w3, eps=1e-5))
    assert out3.dtype == jnp.bfloat16
    assert jnp.allclose(out3.astype(jnp.float32),
                        rms_normalization_ref(x3, w3, eps=1e-5).astype(jnp.float32),
                        atol=2e-2, rtol=2e-2), "mismatch (bf16)"

    # D) Non-power-of-two hidden with row padding (dim=48 -> groups=8, rows=14).
    x4 = jax.random.normal(k4, (2, 7, 48), dtype=jnp.float32)
    w4 = 1.0 + 0.05 * jax.random.normal(kw, (48,), dtype=jnp.float32)
    out4 = jax.block_until_ready(rms_normalization(x4, w4, eps=1e-5))
    assert out4.shape == x4.shape
    assert jnp.allclose(out4, rms_normalization_ref(x4, w4, eps=1e-5),
                        atol=1e-5, rtol=1e-5), "mismatch (padded fold dim=48)"

    # E) Multi-block ragged grid (forced tiny tile target -> cap tile + masked tail).
    x5 = jax.random.normal(k5, (25, 8, 128), dtype=jnp.float32)
    w5 = jnp.ones((128,), dtype=jnp.float32)
    out5 = jax.block_until_ready(
        rms_normalization(x5, w5, eps=1e-5, target_tile_bytes=64 * 1024))
    assert jnp.allclose(out5, rms_normalization_ref(x5, w5, eps=1e-5),
                        atol=1e-5, rtol=1e-5), "mismatch (ragged grid)"

    print("KERNEL_OK")
</pallas_src>

<mosaic_0001>
module attributes {stable_mosaic.version = 11 : i64} {
  func.func @_rmsnorm_kernel_grouped(%arg0: i32, %arg1: memref<4x128xf32, #tpu.memory_space<vmem>>, %arg2: memref<1x128xf32, #tpu.memory_space<vmem>>, %arg3: memref<128x4xf32, #tpu.memory_space<vmem>>, %arg4: memref<4x128xf32, #tpu.memory_space<vmem>>, %arg5: memref<4x128xf32, #tpu.memory_space<vmem>>) attributes {dimension_semantics = [#tpu.dimension_semantics<parallel>], iteration_bounds = array<i64: 1>, scalar_prefetch = 0 : i64, scratch_operands = 0 : i64, tpu.core_type = #tpu.core_type<tc>, window_params = [{transform_indices = @transform_0, window_bounds = array<i64: 4, 128>}, {pipeline_mode = #tpu.pipeline_mode<synchronous>, transform_indices = @transform_1, window_bounds = array<i64: 1, 128>}, {pipeline_mode = #tpu.pipeline_mode<synchronous>, transform_indices = @transform_2, window_bounds = array<i64: 128, 4>}, {pipeline_mode = #tpu.pipeline_mode<synchronous>, transform_indices = @transform_3, window_bounds = array<i64: 4, 128>}, {transform_indices = @transform_4, window_bounds = array<i64: 4, 128>}]} {
    %c0 = arith.constant 0 : index
    %c0_0 = arith.constant 0 : index
    %0 = vector.load %arg1[%c0, %c0_0] : memref<4x128xf32, #tpu.memory_space<vmem>>, vector<4x128xf32>
    %1 = arith.mulf %0, %0 : vector<4x128xf32>
    %c0_1 = arith.constant 0 : index
    %c0_2 = arith.constant 0 : index
    %2 = vector.load %arg3[%c0_1, %c0_2] : memref<128x4xf32, #tpu.memory_space<vmem>>, vector<128x4xf32>
    %cst = arith.constant dense<0.000000e+00> : vector<4x4xf32>
    %3 = tpu.matmul %1, %2, %cst {dimension_numbers = #tpu.dot_dimension_numbers<[1], [0], [0], [1], [0, 0, 1, 1], [], []>} : vector<4x128xf32>, vector<128x4xf32>, vector<4x4xf32> -> vector<4x4xf32>
    %cst_3 = arith.constant 3.125000e-02 : f32
    %4 = vector.broadcast %cst_3 : f32 to vector<4x4xf32>
    %5 = arith.mulf %3, %4 : vector<4x4xf32>
    %cst_4 = arith.constant 9.99999974E-6 : f32
    %6 = vector.broadcast %cst_4 : f32 to vector<4x4xf32>
    %7 = arith.addf %5, %6 : vector<4x4xf32>
    %8 = math.rsqrt %7 : vector<4x4xf32>
    %c0_5 = arith.constant 0 : index
    %c0_6 = arith.constant 0 : index
    %9 = vector.load %arg4[%c0_5, %c0_6] : memref<4x128xf32, #tpu.memory_space<vmem>>, vector<4x128xf32>
    %cst_7 = arith.constant dense<0.000000e+00> : vector<4x128xf32>
    %10 = tpu.matmul %8, %9, %cst_7 {dimension_numbers = #tpu.dot_dimension_numbers<[1], [0], [0], [1], [0, 0, 1, 1], [], []>} : vector<4x4xf32>, vector<4x128xf32>, vector<4x128xf32> -> vector<4x128xf32>
    %11 = arith.mulf %0, %10 : vector<4x128xf32>
    %c0_8 = arith.constant 0 : index
    %c0_9 = arith.constant 0 : index
    %12 = vector.load %arg2[%c0_8, %c0_9] : memref<1x128xf32, #tpu.memory_space<vmem>>, vector<1x128xf32>
    %13 = vector.broadcast %12 : vector<1x128xf32> to vector<4x128xf32>
    %14 = arith.mulf %11, %13 : vector<4x128xf32>
    %c0_10 = arith.constant 0 : index
    %c0_11 = arith.constant 0 : index
    %15 = vector.load %arg5[%c0_10, %c0_11] : memref<4x128xf32, #tpu.memory_space<vmem>>, vector<4x128xf32>
    tpu.vector_store %arg5[%c0_10, %c0_11], %14 {strides = array<i32>} : memref<4x128xf32, #tpu.memory_space<vmem>>, vector<4x128xf32>,
    return
  }
  func.func @transform_0(%arg0: i32) -> (i32, i32) {
    %c0_i32 = arith.constant 0 : i32
    %c0_i32_0 = arith.constant 0 : i32
    return %arg0, %c0_i32 : i32, i32
  }
  func.func @transform_1(%arg0: i32) -> (i32, i32) {
    %c0_i32 = arith.constant 0 : i32
    %c0_i32_0 = arith.constant 0 : i32
    %c0_i32_1 = arith.constant 0 : i32
    return %c0_i32, %c0_i32_0 : i32, i32
  }
  func.func @transform_2(%arg0: i32) -> (i32, i32) {
    %c0_i32 = arith.constant 0 : i32
    %c0_i32_0 = arith.constant 0 : i32
    %c0_i32_1 = arith.constant 0 : i32
    return %c0_i32, %c0_i32_0 : i32, i32
  }
  func.func @transform_3(%arg0: i32) -> (i32, i32) {
    %c0_i32 = arith.constant 0 : i32
    %c0_i32_0 = arith.constant 0 : i32
    %c0_i32_1 = arith.constant 0 : i32
    return %c0_i32, %c0_i32_0 : i32, i32
  }
  func.func @transform_4(%arg0: i32) -> (i32, i32) {
    %c0_i32 = arith.constant 0 : i32
    %c0_i32_0 = arith.constant 0 : i32
    return %arg0, %c0_i32 : i32, i32
  }
}

</mosaic_0001>

<bundles_post_ra>
// kernel: tpu_custom_call.1
= control target key start
LH: loop header
LB: loop body
LE: loop exit
PB: predicated region body
PF: predicated region fallthrough
CT: control target
= control target key end

     0   :  { %v301_v1 = vmov 0.0   ;;  %vm302_vm0 = vmmov 0   ;;  %s389_s0 = inlined_call_operand.vmem [shape: f32[4,128], index: 0, kind: input, shape index: {}]   ;;  %s390_s1 = inlined_call_operand.vmem [shape: f32[1,128], index: 1, kind: input, shape index: {}]   ;;  %s391_s2 = inlined_call_operand.vmem [shape: f32[128,4], index: 2, kind: input, shape index: {}]   ;;  %s392_s3 = inlined_call_operand.vmem [shape: f32[4,128], index: 3, kind: input, shape index: {}]   ;;  %s393_s4 = inlined_call_operand.hbm [shape: f32[4,128], index: 4, kind: output, shape index: {}]  }
   0x1   :  { %v35_v0 = vld [vmem:[%s391_s2 + $0x78] sm:$0xff]  ;;  %234 = vmatprep.subr.mxu0 %v301_v1  ;;  %v34_v2 = vld [vmem:[%s391_s2 + $0x70] sm:$0xff]  ;;  %266 = vmatprep.mubr.msk.f32.mxu0 %vm302_vm0, %v301_v1  ;;  %v33_v3 = vld [vmem:[%s391_s2 + $0x68] sm:$0xff] }
   0x2   :  { %235 = vmatpush3.msra.mxu0 %v35_v0  ;;  %269 = vmatprep.subr.mxu1 %v301_v1  ;;  %v32_v4 = vld [vmem:[%s391_s2 + $0x60] sm:$0xff] }
   0x3   :  { %236 = vmatprep.subr.mxu0 %v301_v1  ;;  %271 = vmatprep.mubr.msk.f32.mxu1 %vm302_vm0, %v301_v1 }
   0x4   :  { %237 = vmatpush3.msra.mxu0 %v34_v2 }
   0x5   :  { %238 = vmatprep.subr.mxu0 %v301_v1 }
   0x6   :  { %9 = vsyncpa [#allocation3], 0  ;;  %239 = vmatpush3.msra.mxu0 %v33_v3  ;;  %v31_v5 = vld [vmem:[%s391_s2 + $0x58] sm:$0xff]  ;;  %v30_v6 = vld [vmem:[%s391_s2 + $0x50] sm:$0xff]  ;;  %vm114_vm1 = vcmask 1043456   ;;  %vm110_vm2 = vcmask 31744  }
   0x7   :  { %240 = vmatprep.subr.mxu0 %v301_v1  ;;  %v29_v7 = vld [vmem:[%s391_s2 + $0x48] sm:$0xff]  ;;  %v28_v8 = vld [vmem:[%s391_s2 + $0x40] sm:$0xff]  ;;  %v27_v9 = vld [vmem:[%s391_s2 + $0x38] sm:$0xff]  ;;  %s303_s25 = smov [#allocation2]  }
   0x8   :  { %241 = vmatpush3.msra.mxu0 %v32_v4  ;;  %v26_v10 = vld [vmem:[%s391_s2 + $0x30] sm:$0xff]  ;;  %v25_v11 = vld [vmem:[%s391_s2 + $0x28] sm:$0xff]  ;;  %v24_v12 = vld [vmem:[%s391_s2 + $0x20] sm:$0xff]  ;;  %s204_s26 = sshll.u32 %s303_s25, 4  ;;  %s205_s26 = int_to_ptr.vmem [resolvable:$true] %s204_s26 }
   0x9   :  { %242 = vmatprep.subr.mxu0 %v301_v1  ;;  %v23_v13 = vld [vmem:[%s391_s2 + $0x18] sm:$0xff]  ;;  %v22_v14 = vld [vmem:[%s391_s2 + $0x10] sm:$0xff]  ;;  %v18_v15 = vld [vmem:[%s389_s0] sm:$0xf]  ;;  %p284_p1 = scmp.lt.s32.totalorder %s205_s26, %s205_s26 }
   0xa   :  { %243 = vmatpush3.msra.mxu0 %v31_v5  ;;  %v21_v16 = vld [vmem:[%s391_s2 + $0x8] sm:$0xff]  ;;  %v20_v17 = vld [vmem:[%s391_s2] sm:$0xff]  ;;  %v19_v18 = vmul.f32 %v18_v15, %v18_v15 }
   0xb   :  { %244 = vmatprep.subr.mxu0 %v301_v1  ;;  %v109_v19 = vld [vmem:[%s392_s3] sm:$0xf]  ;;  %s279_s3 = scalar_lea.vmem %s205_s26, 64 }
   0xc   :  { %245 = vmatpush3.msra.mxu0 %v30_v6  ;;  %270 = vmatpush3.msk.msra.mxu1 %vm114_vm1, %v109_v19  ;;  %v214_v26 = vld [vmem:[%s390_s1] ss:$0 sm:$0xff]  ;;  %p280_p0 = scmp.ne.s32.totalorder %s205_s26, %s279_s3  ;;  %p285_p2 = scmp.lt.s32.totalorder %s279_s3, %s279_s3 }
   0xd   :  { %246 = vmatprep.subr.mxu0 %v301_v1 }
   0xe   :  { %247 = vmatpush3.msra.mxu0 %v29_v7  ;;  %p286_p3 = por %p285_p2, %p284_p1 }
   0xf   :  { %248 = vmatprep.subr.mxu0 %v301_v1 }
  0x10   :  { %249 = vmatpush3.msra.mxu0 %v28_v8  ;;  %p287_p4 = pnand %p286_p3, %p280_p0 }
  0x11   :  { %250 = vmatprep.subr.mxu0 %v301_v1 }
  0x12   :  { %251 = vmatpush3.msra.mxu0 %v27_v9 }
  0x13   :  { %252 = vmatprep.subr.mxu0 %v301_v1 }
  0x14   :  { %253 = vmatpush3.msra.mxu0 %v26_v10 }
  0x15   :  { %254 = vmatprep.subr.mxu0 %v301_v1 }
  0x16   :  { %255 = vmatpush3.msra.mxu0 %v25_v11 }
  0x17   :  { %256 = vmatprep.subr.mxu0 %v301_v1 }
  0x18   :  { %257 = vmatpush3.msra.mxu0 %v24_v12 }
  0x19   :  { %258 = vmatprep.subr.mxu0 %v301_v1 }
  0x1a   :  { %259 = vmatpush3.msra.mxu0 %v23_v13 }
  0x1b   :  { %260 = vmatprep.subr.mxu0 %v301_v1 }
  0x1c   :  { %261 = vmatpush3.msra.mxu0 %v22_v14 }
  0x1d   :  { %262 = vmatprep.subr.mxu0 %v301_v1 }
  0x1e   :  { %263 = vmatpush3.msra.mxu0 %v21_v16 }
  0x1f   :  { %264 = vmatprep.subr.mxu0 %v301_v1 }
  0x20   :  { %265 = vmatpush3.msra.mxu0 %v20_v17 }
  0x21   :  { %267 = vmatmul.mubr.f32.vlgmr.msra.gmra.mxu0 %v19_v18 }
  0xe1   :  { %v102_v20 = vpop.f32.mrf.mxu0 }
  0xe2   :  { %v106_v21 = vmul.f32 0.03125, %v102_v20 }
  0xe3   :  { %v268_v22 = vpop.f32.mrf.mxu0 }
  0xe4   :  { %v107_v23 = vadd.f32 1e-05, %v106_v21 }
  0xe6   :  { %277 = vrsqrt.f32 %v107_v23 }
  0xf3   :  { %v278_v24 = vpop.eup %277 }
  0xf4   :  { %272 = vmatmul.mubr.msk.f32.vlgmr.msra.gmra.mxu1 %vm110_vm2, %v278_v24 }
 0x1b4   :  { %v184_v25 = vpop.f32.mrf.mxu1 }
 0x1b5   :  { %v188_v27 = vmul.f32 %v184_v25, %v18_v15 }
 0x1b6   :  { %v273_v28 = vpop.f32.mrf.mxu1 }
 0x1b7   :  { %v196_v29 = vmul.f32 %v214_v26, %v188_v27 }
 0x1b9   :  { %197 = vst [vmem:[#allocation2] sm:$0xf] %v196_v29 }
 0x1ba   :  { %290 = shalt.err (!%p287_p4)
}
 0x1bb   :  { %207 = dma.vmem_to_hbm [thread:$0]  %s205_s26, 64, %s393_s4, [#allocation3]  }
 0x1bc   :  { %299 = dma.done.wait [#allocation3], 64  }
 0x1bd   :  { %300 = vsyncadd [#allocation3], 4294967232 }
 0x1be   :  { %211 = vsyncpa [#allocation3], 1 }

</bundles_post_ra>
